<compile_context>
chip_gen: v6e
topology: v6e:2x2x1
jax: 0.10.0
libtpu: 0.0.40
codegen_flags: <defaults>
</compile_context>

<pallas_src>
import math

import jax
import jax.numpy as jnp
from jax.experimental import pallas as pl
from jax.experimental.pallas import tpu as pltpu

_LANE = 128       # lane width (last dim) -> unmasked MXU passes / dense stores
_BT_ALIGN = 16    # bf16 sublane granularity (output tile is bf16)
_MAX_BT = 2048    # keeps the double-buffered working set well under v5e's
                  # 16 MiB default scoped VMEM


def _round_up(n, m):
    return ((n + m - 1) // m) * m


def _mlp_kernel(x_ref, w1_ref, b1_ref, w2_ref, b2_ref, w3_ref, b3_ref, o_ref):
    """Fused 3-layer MLP: relu(relu(x@W1+b1)@W2+b2)@W3+b3 for one batch tile."""
    x = x_ref[...].astype(jnp.bfloat16)                                  # (bt, S) f32 -> bf16
    h1 = jnp.dot(x, w1_ref[...], preferred_element_type=jnp.float32) + b1_ref[...]
    h1 = jnp.maximum(h1, 0.0)                                            # f32 VPU work
    h2 = jnp.dot(h1.astype(jnp.bfloat16), w2_ref[...],
                 preferred_element_type=jnp.float32) + b2_ref[...]
    h2 = jnp.maximum(h2, 0.0)
    out = jnp.dot(h2.astype(jnp.bfloat16), w3_ref[...],
                  preferred_element_type=jnp.float32) + b3_ref[...]
    o_ref[...] = out.astype(o_ref.dtype)                                 # bf16 lane-dense store


def init_params(key, state_size, action_size, hidden_layers=(64, 64)):
    """f32 params mimicking torch.nn.Linear init; W_i is (in, out), b_i is (1, out)."""
    sizes = [state_size, *hidden_layers, action_size]
    params = []
    for i in range(len(sizes) - 1):
        fan_in, fan_out = sizes[i], sizes[i + 1]
        key, kw, kb = jax.random.split(key, 3)
        bound = 1.0 / math.sqrt(fan_in)
        w = jax.random.uniform(kw, (fan_in, fan_out), jnp.float32, -bound, bound)
        b = jax.random.uniform(kb, (1, fan_out), jnp.float32, -bound, bound)
        params += [w, b]
    return tuple(params)


def prepare_params(params):
    """Pad weight OUTPUT dims (and inner input dims) to 128 lanes; W1's input
    dim stays = state_size so x streams unpadded.  Weights -> bf16 (MXU fast
    path, half the weight DMA); biases stay f32 (bias add + ReLU run in f32)."""
    w1, b1, w2, b2, w3, b3 = params

    def pad_w(w, in_pad):
        i, o = w.shape
        out = jnp.zeros((in_pad, _round_up(o, _LANE)), jnp.bfloat16)
        return out.at[:i, :o].set(w.astype(jnp.bfloat16))

    def pad_b(b):
        o = b.shape[-1]
        out = jnp.zeros((1, _round_up(o, _LANE)), jnp.float32)
        return out.at[:, :o].set(b.astype(jnp.float32))

    return (pad_w(w1, w1.shape[0]),                      # (state_size, 128)
            pad_b(b1),
            pad_w(w2, _round_up(w2.shape[0], _LANE)),    # (128, 128)
            pad_b(b2),
            pad_w(w3, _round_up(w3.shape[0], _LANE)),    # (128, 128)
            pad_b(b3))


def evolvable_nn_forward(x, padded_params, action_size, *, batch_tile=1024,
                         full_output=False):
    """x: (batch, state_size) f32.  padded_params from prepare_params().

    Returns (batch, action_size) f32 by default.  With full_output=True the
    padded (b_pad, 128) bf16 block is returned as-is (valid data in
    [:batch, :action_size]); use that for big populations to skip the extra
    slice/upcast HBM pass and fuse the downstream consumer yourself.
    """
    w1, b1, w2, b2, w3, b3 = padded_params
    batch, state_size = x.shape
    assert w1.shape[0] == state_size, "W1 input dim must equal state_size"
    h1_pad, h2_pad, a_pad = w1.shape[1], w2.shape[1], w3.shape[1]

    # --- batch tile selection ------------------------------------------------
    bt = max(_BT_ALIGN, min(int(batch_tile), _MAX_BT))
    bt = min(bt, _round_up(batch, _BT_ALIGN))
    bt = _round_up(bt, _BT_ALIGN)
    # v7x has 2 TensorCores: make sure the "parallel" batch axis gets >= 2
    # grid steps whenever the population is big enough to split.
    while batch > _BT_ALIGN and bt > _BT_ALIGN and _round_up(batch, bt) // bt < 2:
        bt = _round_up(bt // 2, _BT_ALIGN)
    b_pad = _round_up(batch, bt)

    # Only a batch-dim pad, only when needed; feature dim stays unpadded and
    # the bf16 cast happens in-kernel (no wrapper pad/cast HBM round trip).
    x_in = x if b_pad == batch else jnp.pad(x, ((0, b_pad - batch), (0, 0)))

    grid = (b_pad // bt,)
    stream = lambda shape: pl.BlockSpec(shape, lambda i: (i, 0))   # over batch
    pinned = lambda shape: pl.BlockSpec(shape, lambda i: (0, 0))   # resident weights

    # Advisory hint: flops = actual MXU work (padded dims), bytes = actual DMA.
    flops = 2 * b_pad * (state_size * h1_pad + h1_pad * h2_pad + h2_pad * a_pad)
    bytes_accessed = (
        int(x_in.size) * x_in.dtype.itemsize
        + sum(int(p.size) * p.dtype.itemsize for p in padded_params)
        + b_pad * a_pad * 2                                   # bf16 writeback
    )
    cost = pl.CostEstimate(flops=int(flops), transcendentals=0,
                           bytes_accessed=int(bytes_accessed))

    out = pl.pallas_call(
        _mlp_kernel,
        out_shape=jax.ShapeDtypeStruct((b_pad, a_pad), jnp.bfloat16),
        grid=grid,
        in_specs=[
            stream((bt, state_size)),        # unpadded f32 x (last dim = full array dim)
            pinned(w1.shape), pinned(b1.shape),
            pinned(w2.shape), pinned(b2.shape),
            pinned(w3.shape), pinned(b3.shape),
        ],
        out_specs=stream((bt, a_pad)),
        compiler_params=pltpu.CompilerParams(
            dimension_semantics=("parallel",)),
        cost_estimate=cost,
    )(x_in, w1, b1, w2, b2, w3, b3)

    if full_output:
        return out
    # Single small fused slice + upcast; fuses into the consumer under jit.
    return out[:batch, :action_size].astype(jnp.float32)


def reference_forward(x, params):
    """Pure-JAX reference with the same bf16-weight / f32-accumulate recipe."""
    w1, b1, w2, b2, w3, b3 = params
    xb = x.astype(jnp.bfloat16)
    h1 = jnp.dot(xb, w1.astype(jnp.bfloat16),
                 preferred_element_type=jnp.float32) + b1
    h1 = jnp.maximum(h1, 0.0)
    h2 = jnp.dot(h1.astype(jnp.bfloat16), w2.astype(jnp.bfloat16),
                 preferred_element_type=jnp.float32) + b2
    h2 = jnp.maximum(h2, 0.0)
    return jnp.dot(h2.astype(jnp.bfloat16), w3.astype(jnp.bfloat16),
                   preferred_element_type=jnp.float32) + b3


if __name__ == "__main__":
    key = jax.random.PRNGKey(0)
    key, kx = jax.random.split(key)

    # Small shapes consistent with the module; batch=20 exercises the
    # batch-pad path AND the "split into >=2 grid steps" logic (bt -> 16).
    batch, state_size, action_size = 20, 32, 8
    x = jax.random.normal(kx, (batch, state_size), jnp.float32)
    params = init_params(key, state_size, action_size, hidden_layers=(64, 64))
    padded = prepare_params(params)

    out = evolvable_nn_forward(x, padded, action_size)        # default tile policy
    out = jax.block_until_ready(out)

    ref = reference_forward(x, params)
    assert out.shape == (batch, action_size)
    assert jnp.allclose(out, ref, atol=2e-2, rtol=2e-2), \
        float(jnp.max(jnp.abs(out - ref)))

    # Sanity vs. pure-f32 math (loose tolerance: bf16 weights/acts/output).
    w1, b1, w2, b2, w3, b3 = params
    f32_ref = jnp.maximum(jnp.maximum(x @ w1 + b1, 0.0) @ w2 + b2, 0.0) @ w3 + b3
    assert jnp.allclose(out, f32_ref, atol=5e-2, rtol=5e-2)

    # Padded-block fast path (no slice pass): same valid region.
    out_full = jax.block_until_ready(
        evolvable_nn_forward(x, padded, action_size, full_output=True))
    assert jnp.allclose(out_full[:batch, :action_size].astype(jnp.float32),
                        out, atol=1e-6)

    print("KERNEL_OK")
</pallas_src>

<mosaic_0001>
module attributes {stable_mosaic.version = 11 : i64} {
  func.func @_mlp_kernel(%arg0: i32, %arg1: memref<16x32xf32, #tpu.memory_space<vmem>>, %arg2: memref<32x128xbf16, #tpu.memory_space<vmem>>, %arg3: memref<1x128xf32, #tpu.memory_space<vmem>>, %arg4: memref<128x128xbf16, #tpu.memory_space<vmem>>, %arg5: memref<1x128xf32, #tpu.memory_space<vmem>>, %arg6: memref<128x128xbf16, #tpu.memory_space<vmem>>, %arg7: memref<1x128xf32, #tpu.memory_space<vmem>>, %arg8: memref<16x128xbf16, #tpu.memory_space<vmem>>) attributes {dimension_semantics = [#tpu.dimension_semantics<parallel>], iteration_bounds = array<i64: 2>, scalar_prefetch = 0 : i64, scratch_operands = 0 : i64, tpu.core_type = #tpu.core_type<tc>, window_params = [{transform_indices = @transform_0, window_bounds = array<i64: 16, 32>}, {pipeline_mode = #tpu.pipeline_mode<synchronous>, transform_indices = @transform_1, window_bounds = array<i64: 32, 128>}, {pipeline_mode = #tpu.pipeline_mode<synchronous>, transform_indices = @transform_2, window_bounds = array<i64: 1, 128>}, {pipeline_mode = #tpu.pipeline_mode<synchronous>, transform_indices = @transform_3, window_bounds = array<i64: 128, 128>}, {pipeline_mode = #tpu.pipeline_mode<synchronous>, transform_indices = @transform_4, window_bounds = array<i64: 1, 128>}, {pipeline_mode = #tpu.pipeline_mode<synchronous>, transform_indices = @transform_5, window_bounds = array<i64: 128, 128>}, {pipeline_mode = #tpu.pipeline_mode<synchronous>, transform_indices = @transform_6, window_bounds = array<i64: 1, 128>}, {transform_indices = @transform_7, window_bounds = array<i64: 16, 128>}]} {
    %c0 = arith.constant 0 : index
    %c0_0 = arith.constant 0 : index
    %0 = vector.load %arg1[%c0, %c0_0] : memref<16x32xf32, #tpu.memory_space<vmem>>, vector<16x32xf32>
    %1 = arith.truncf %0 : vector<16x32xf32> to vector<16x32xbf16>
    %c0_1 = arith.constant 0 : index
    %c0_2 = arith.constant 0 : index
    %2 = vector.load %arg2[%c0_1, %c0_2] : memref<32x128xbf16, #tpu.memory_space<vmem>>, vector<32x128xbf16>
    %cst = arith.constant dense<0.000000e+00> : vector<16x128xf32>
    %3 = tpu.matmul %1, %2, %cst {dimension_numbers = #tpu.dot_dimension_numbers<[1], [0], [0], [1], [0, 0, 1, 1], [], []>} : vector<16x32xbf16>, vector<32x128xbf16>, vector<16x128xf32> -> vector<16x128xf32>
    %c0_3 = arith.constant 0 : index
    %c0_4 = arith.constant 0 : index
    %4 = vector.load %arg3[%c0_3, %c0_4] : memref<1x128xf32, #tpu.memory_space<vmem>>, vector<1x128xf32>
    %5 = vector.broadcast %4 : vector<1x128xf32> to vector<16x128xf32>
    %6 = arith.addf %3, %5 : vector<16x128xf32>
    %cst_5 = arith.constant 0.000000e+00 : f32
    %7 = vector.broadcast %cst_5 : f32 to vector<16x128xf32>
    %8 = arith.maximumf %6, %7 : vector<16x128xf32>
    %9 = arith.truncf %8 : vector<16x128xf32> to vector<16x128xbf16>
    %c0_6 = arith.constant 0 : index
    %c0_7 = arith.constant 0 : index
    %10 = vector.load %arg4[%c0_6, %c0_7] : memref<128x128xbf16, #tpu.memory_space<vmem>>, vector<128x128xbf16>
    %cst_8 = arith.constant dense<0.000000e+00> : vector<16x128xf32>
    %11 = tpu.matmul %9, %10, %cst_8 {dimension_numbers = #tpu.dot_dimension_numbers<[1], [0], [0], [1], [0, 0, 1, 1], [], []>} : vector<16x128xbf16>, vector<128x128xbf16>, vector<16x128xf32> -> vector<16x128xf32>
    %c0_9 = arith.constant 0 : index
    %c0_10 = arith.constant 0 : index
    %12 = vector.load %arg5[%c0_9, %c0_10] : memref<1x128xf32, #tpu.memory_space<vmem>>, vector<1x128xf32>
    %13 = vector.broadcast %12 : vector<1x128xf32> to vector<16x128xf32>
    %14 = arith.addf %11, %13 : vector<16x128xf32>
    %cst_11 = arith.constant 0.000000e+00 : f32
    %15 = vector.broadcast %cst_11 : f32 to vector<16x128xf32>
    %16 = arith.maximumf %14, %15 : vector<16x128xf32>
    %17 = arith.truncf %16 : vector<16x128xf32> to vector<16x128xbf16>
    %c0_12 = arith.constant 0 : index
    %c0_13 = arith.constant 0 : index
    %18 = vector.load %arg6[%c0_12, %c0_13] : memref<128x128xbf16, #tpu.memory_space<vmem>>, vector<128x128xbf16>
    %cst_14 = arith.constant dense<0.000000e+00> : vector<16x128xf32>
    %19 = tpu.matmul %17, %18, %cst_14 {dimension_numbers = #tpu.dot_dimension_numbers<[1], [0], [0], [1], [0, 0, 1, 1], [], []>} : vector<16x128xbf16>, vector<128x128xbf16>, vector<16x128xf32> -> vector<16x128xf32>
    %c0_15 = arith.constant 0 : index
    %c0_16 = arith.constant 0 : index
    %20 = vector.load %arg7[%c0_15, %c0_16] : memref<1x128xf32, #tpu.memory_space<vmem>>, vector<1x128xf32>
    %21 = vector.broadcast %20 : vector<1x128xf32> to vector<16x128xf32>
    %22 = arith.addf %19, %21 : vector<16x128xf32>
    %23 = arith.truncf %22 : vector<16x128xf32> to vector<16x128xbf16>
    %c0_17 = arith.constant 0 : index
    %c0_18 = arith.constant 0 : index
    %24 = vector.load %arg8[%c0_17, %c0_18] : memref<16x128xbf16, #tpu.memory_space<vmem>>, vector<16x128xbf16>
    tpu.vector_store %arg8[%c0_17, %c0_18], %23 {strides = array<i32>} : memref<16x128xbf16, #tpu.memory_space<vmem>>, vector<16x128xbf16>,
    return
  }
  func.func @transform_0(%arg0: i32) -> (i32, i32) {
    %c0_i32 = arith.constant 0 : i32
    %c0_i32_0 = arith.constant 0 : i32
    return %arg0, %c0_i32 : i32, i32
  }
  func.func @transform_1(%arg0: i32) -> (i32, i32) {
    %c0_i32 = arith.constant 0 : i32
    %c0_i32_0 = arith.constant 0 : i32
    %c0_i32_1 = arith.constant 0 : i32
    return %c0_i32, %c0_i32_0 : i32, i32
  }
  func.func @transform_2(%arg0: i32) -> (i32, i32) {
    %c0_i32 = arith.constant 0 : i32
    %c0_i32_0 = arith.constant 0 : i32
    %c0_i32_1 = arith.constant 0 : i32
    return %c0_i32, %c0_i32_0 : i32, i32
  }
  func.func @transform_3(%arg0: i32) -> (i32, i32) {
    %c0_i32 = arith.constant 0 : i32
    %c0_i32_0 = arith.constant 0 : i32
    %c0_i32_1 = arith.constant 0 : i32
    return %c0_i32, %c0_i32_0 : i32, i32
  }
  func.func @transform_4(%arg0: i32) -> (i32, i32) {
    %c0_i32 = arith.constant 0 : i32
    %c0_i32_0 = arith.constant 0 : i32
    %c0_i32_1 = arith.constant 0 : i32
    return %c0_i32, %c0_i32_0 : i32, i32
  }
  func.func @transform_5(%arg0: i32) -> (i32, i32) {
    %c0_i32 = arith.constant 0 : i32
    %c0_i32_0 = arith.constant 0 : i32
    %c0_i32_1 = arith.constant 0 : i32
    return %c0_i32, %c0_i32_0 : i32, i32
  }
  func.func @transform_6(%arg0: i32) -> (i32, i32) {
    %c0_i32 = arith.constant 0 : i32
    %c0_i32_0 = arith.constant 0 : i32
    %c0_i32_1 = arith.constant 0 : i32
    return %c0_i32, %c0_i32_0 : i32, i32
  }
  func.func @transform_7(%arg0: i32) -> (i32, i32) {
    %c0_i32 = arith.constant 0 : i32
    %c0_i32_0 = arith.constant 0 : i32
    return %arg0, %c0_i32 : i32, i32
  }
}

</mosaic_0001>

<bundles_post_ra>
// kernel: tpu_custom_call.1
= control target key start
LH: loop header
LB: loop body
LE: loop exit
PB: predicated region body
PF: predicated region fallthrough
CT: control target
= control target key end

     0   :  { %s1463_s0 = inlined_call_operand.hbm [shape: f32[32,32], index: 0, kind: input, shape index: {}]   ;;  %s1464_s1 = inlined_call_operand.hbm [shape: bf16[32,128], index: 1, kind: input, shape index: {}]   ;;  %s1465_s2 = inlined_call_operand.vmem [shape: f32[1,128], index: 2, kind: input, shape index: {}]   ;;  %s1466_s3 = inlined_call_operand.hbm [shape: bf16[128,128], index: 3, kind: input, shape index: {}]   ;;  %s1467_s4 = inlined_call_operand.vmem [shape: f32[1,128], index: 4, kind: input, shape index: {}]   ;;  %s1468_s5 = inlined_call_operand.hbm [shape: bf16[128,128], index: 5, kind: input, shape index: {}]   ;;  %s1469_s6 = inlined_call_operand.vmem [shape: f32[1,128], index: 6, kind: input, shape index: {}]   ;;  %s1470_s7 = inlined_call_operand.hbm [shape: bf16[32,128], index: 7, kind: output, shape index: {}]  }
   0x1   :  { %1475 = sst [smem:[#allocation15_spill]] %s1464_s1 }
   0x2   :  { %12 = vsyncpa [#allocation3], 0 }
   0x3   :  { %14 = vsyncpa [#allocation3 + $0x1], 0 }
   0x4   :  { %15 = vsyncpa [#allocation6], 0 }
   0x5   :  { %16 = vsyncpa [#allocation9], 0 }
   0x6   :  { %17 = vsyncpa [#allocation4], 0 }
   0x7   :  { %19 = vsyncpa [#allocation4 + $0x1], 0  ;;  %s1229_s24 = smov 0   ;;  %s1231_s25 = smov 0  }
   0x8   :  { %s1233_s26 = smov 0   ;;  %s1235_s27 = smov 0  }
   0x9 LB: > { %s1250_s28 = sadd.s32 4294967295, %s1174_s27   ;;  %s771_s29 = sadd.s32 4294967294, %s1174_s27   ;;  %s1174_s27 = sphi %s1235_s27, %s1496_s27   ;;  %s1170_s26 = sphi %s1233_s26, %s1495_s26   ;;  %s1166_s25 = sphi %s1231_s25, %s1494_s25   ;;  %s1162_s24 = sphi %s1229_s24, %s1493_s24  }
   0xa   : > { %p45_p0 = scmp.ne.s32.totalorder %s1166_s25, %s1162_s24  ;;  %p1471_p1 = scmp.eq.s32.totalorder %s1250_s28, 0 }
   0xb   : > { %p201_p3 = scmp.eq.s32.totalorder %s771_s29, 1  ;;  %p772_p5 = scmp.ge.s32.totalorder %s1174_s27, 1 }
   0xc   : > { %p1259_p4 = por %p1471_p1, %p45_p0  ;;  %p208_p7 = scmp.lt.s32.totalorder %s1174_s27, 3 }
   0xd   : > { %p1264_p6 = por %p201_p3, %p45_p0  ;;  %s1176_s10 = smov [#allocation5]  }
   0xe   : > { %s1476_s30 = scalar_select %p1259_p4, 1, 0 }
   0xf   : > { %s1477_s8 = scalar_select %p1264_p6, 1, 0 }
  0x10   : > { %p1269_p8 = pnand %p772_p5, %p208_p7  ;;  %s220_s11 = sshll.u32 %s1176_s10, 4  ;;  %s221_s11 = int_to_ptr.vmem [resolvable:$true] %s220_s11 }
  0x11   : > { %s1177_s13 = smov [#allocation7]   ;;  %s1178_s15 = smov [#allocation8]  }
  0x12   : > { %s1478_s9 = scalar_select %p1269_p8, 1, 0 }
  0x13   : > { %p909_p9 = pneg %p1269_p8  ;;  %s236_s14 = sshll.u32 %s1177_s13, 4  ;;  %s237_s14 = int_to_ptr.vmem [resolvable:$true] %s236_s14 }
  0x14   : > { %s252_s16 = sshll.u32 %s1178_s15, 4  ;;  %s1007_s17 = scalar_lea.vmem %s221_s11, 256  ;;  %s253_s16 = int_to_ptr.vmem [resolvable:$true] %s252_s16 }
  0x15   : > { %p1278_p11 = pnand %p909_p9, %p1471_p1  ;;  %p1008_p13 = scmp.ne.s32.totalorder %s221_s11, %s1007_s17 }
  0x16   : > { %p1015_p5 = scmp.lt.s32.totalorder %s221_s11, %s221_s11  ;;  %p1016_p7 = scmp.lt.s32.totalorder %s1007_s17, %s1007_s17 }
  0x17   : > { %p998_p12 = pneg %p1278_p11 }
  0x18   : > { %p1017_p9 = por %p1016_p7, %p1015_p5 }
  0x19   : > { %p1010_p0 = pnand %p1008_p13, %p998_p12 }
  0x1b   : > { %p1011_p3 = pneg %p1010_p0 }
  0x1d   : > { %p1018_p10 = pnand %p1017_p9, %p1011_p3 }
  0x1f   : > { %1021 = shalt.err (!%p1018_p10)
}
  0x20   : > { %s1179_s18 = smov 64   ;;  %s1180_s19 = smov 4  }
  0x21   : > { %s1480_s1 = sld [smem:[#allocation15_spill]]  ;;  %s1033_s22 = scalar_lea.vmem %s237_s14, 1024 }
  0x22   : > { %p1034_p1 = scmp.ne.s32.totalorder %s237_s14, %s1033_s22  ;;  %p1041_p2 = scmp.lt.s32.totalorder %s237_s14, %s237_s14 }
  0x23   : > { %p1042_p6 = scmp.lt.s32.totalorder %s1033_s22, %s1033_s22 }
  0x24   : > { %p1036_p13 = pnand %p1034_p1, %p998_p12 }
  0x25   : > { %p1043_p5 = por %p1042_p6, %p1041_p2 }
  0x26   : > { %p1037_p0 = pneg %p1036_p13 }
  0x27   : > { %912 = dma.hbm_to_vmem [thread:$0]  (!%p1278_p11), %s1480_s1, 256, %s221_s11, [#allocation6], %s1179_s18, %s1179_s18, %s1180_s19  }
  0x28   : > { %p1044_p3 = pnand %p1043_p5, %p1037_p0 }
  0x2a   : > { %1047 = shalt.err (!%p1044_p3)
}
  0x2b   : > { %915 = dma.hbm_to_vmem [thread:$0]  (!%p1278_p11), %s1466_s3, 1024, %s237_s14, [#allocation6], %s1179_s18, %s1179_s18, %s1180_s19  }
  0x2c   : > { %s1059_s10 = scalar_lea.vmem %s253_s16, 1024  ;;  %p1067_p9 = scmp.lt.s32.totalorder %s253_s16, %s253_s16 }
  0x2d   : > { %p1060_p10 = scmp.ne.s32.totalorder %s253_s16, %s1059_s10  ;;  %p1068_p13 = scmp.lt.s32.totalorder %s1059_s10, %s1059_s10 }
  0x2f   : > { %p1062_p7 = pnand %p1060_p10, %p998_p12  ;;  %p1069_p4 = por %p1068_p13, %p1067_p9 }
  0x31   : > { %p1063_p1 = pneg %p1062_p7 }
  0x33   : > { %p1070_p2 = pnand %p1069_p4, %p1063_p1 }
  0x35   : > { %1073 = shalt.err (!%p1070_p2)
}
  0x36   : > { %918 = dma.hbm_to_vmem [thread:$0]  (!%p1278_p11), %s1468_s5, 1024, %s253_s16, [#allocation9], %s1179_s18, %s1179_s18, %s1180_s19  }
  0x37   : > { %s1309_s14 = sadd.s32 1, %s1174_s27   ;;  %s32_s12 = sadd.s32 1, %s1170_s26 }
  0x38   : > { %s29_s15 = ssub.s32 %s1174_s27, %s1309_s14  ;;  %p39_p6 = scmp.ne.s32.totalorder %s1170_s26, %s1166_s25 }
  0x39   : > { %p30_p4 = scmp.eq.s32.totalorder %s29_s15, 0  ;;  %p40_p12 = scmp.eq.s32.totalorder %s1174_s27, 0 }
  0x3a   : > { %p930_p0 = scmp.lt.s32.totalorder %s1174_s27, 2  ;;  %p1481_p3 = scmp.eq.s32.totalorder %s1250_s28, 1 }
  0x3b   : > { %s1319_s17 = scalar_select %p30_p4, %s1170_s26, %s32_s12  }
  0x3c   : > { %p41_p5 = por %p40_p12, %p39_p6  ;;  %p1323_p10 = por %p1481_p3, %p39_p6 }
  0x3d   : > { %s269_s21 = sand.u32 1, %s1170_s26   ;;  %s815_s22 = sshll.u32 %s1174_s27, 8 }
  0x3e   : > { %s1482_s20 = scalar_select %p1323_p10, 1, 0 }
  0x3f   : > { %s777_s16 = sshll.u32 %s269_s21, 4  ;;  %s1332_s23 = scalar_lea.hbm %s1463_s0, %s815_s22 }
  0x40   : > { %s273_s29 = scalar_lea.vmem [#allocation2], %s777_s16  ;;  %p1334_p11 = pnand %p930_p0, %p41_p5 }
  0x41   : > { %s280_s10 = sshll.u32 %s273_s29, 4  ;;  %s1340_s13 = scalar_lea.sflag [#allocation3], %s269_s21  ;;  %s1338_s10 = int_to_ptr.vmem [resolvable:$true] %s280_s10 }
  0x42   : > { %s1074_s15 = scalar_lea.hbm %s1332_s23, 256  ;;  %p1076_p1 = pneg %p1334_p11 }
  0x43   : > { %p1075_p7 = scmp.ne.s32.totalorder %s1332_s23, %s1074_s15  ;;  %s1079_s16 = scalar_lea.hbm %s1463_s0, 512 }
  0x44   : > { %p1080_p2 = scmp.lt.s32.totalorder %s1332_s23, %s1463_s0  ;;  %p1081_p4 = scmp.lt.s32.totalorder %s1079_s16, %s1074_s15 }
  0x45   : > { %p1077_p9 = pnand %p1076_p1, %p1075_p7 }
  0x46   : > { %p1082_p6 = por %p1081_p4, %p1080_p2 }
  0x47   : > { %p1078_p13 = pneg %p1077_p9 }
  0x49   : > { %p1083_p12 = pnand %p1082_p6, %p1078_p13 }
  0x4b   : > { %1086 = shalt.err (!%p1083_p12)
}
  0x4c   : > { %s1087_s21 = scalar_lea.vmem %s1338_s10, 256  ;;  %s1181_s29 = smov [#allocation2]  }
  0x4d   : > { %p1088_p0 = scmp.ne.s32.totalorder %s1338_s10, %s1087_s21  ;;  %s1092_s1 = sshll.u32 %s1181_s29, 4  ;;  %s1093_s1 = int_to_ptr.vmem [resolvable:$false] %s1092_s1 }
  0x4e   : > { %s1094_s12 = scalar_lea.vmem %s1093_s1, 512  ;;  %p1095_p7 = scmp.lt.s32.totalorder %s1338_s10, %s1093_s1 }
  0x4f   : > { %p1090_p5 = pnand %p1088_p0, %p1076_p1  ;;  %p1096_p9 = scmp.lt.s32.totalorder %s1094_s12, %s1087_s21 }
  0x51   : > { %p1091_p3 = pneg %p1090_p5  ;;  %p1097_p10 = por %p1096_p9, %p1095_p7 }
  0x53   : > { %p1098_p8 = pnand %p1097_p10, %p1091_p3 }
  0x55   : > { %1101 = shalt.err (!%p1098_p8)
}
  0x56   : > { %s1182_s15 = smov 128   ;;  %s1183_s22 = smov 8  }
  0x57   : > { %922 = dma.hbm_to_vmem [thread:$0]  (!%p1334_p11), %s1332_s23, 256, %s1338_s10, %s1340_s13, %s1182_s15, %s1182_s15, %s1183_s22  }
  0x58   : > { %p1484_p1 = scmp.ne.s32.totalorder %s1478_s9, 0 }
  0x59   : > { %s1364_s16 = sand.u32 (!%p1484_p1), 1, %s1166_s25   ;;  %p1485_p8 = scmp.ne.s32.totalorder (!%p1484_p1), %s1476_s30, 0 }
  0x5a   : > { %292 = sbr.rel (%p1484_p1) target bundleno = 733 (0x2dd), region = 48  ;;  %s781_s1 = sshll.u32 (!%p1484_p1), %s1364_s16, 4 }
  0x5b   : > { %s295_s18 = scalar_lea.sflag (!%p1484_p1), [#allocation3], %s1364_s16  ;;  %s298_s19 = scalar_lea.vmem (!%p1484_p1), [#allocation2], %s781_s1 }
  0x5f   : > { %1145 = dma.done.wait (%p1485_p8), %s295_s18, 256  }
  0x60   : > { %1147 = vsyncadd (%p1485_p8), %s295_s18, 4294967040  ;;  %p1486_p10 = scmp.eq.s32.totalorder %s1250_s28, 0 }
  0x62   : > { %1149 = dma.done.wait (%p1486_p10), [#allocation6], 1280   ;;  %p1487_p11 = pmov %p1486_p10 }
  0x63   : > { %p1488_p13 = pmov %p1486_p10 }
  0x64   : > { %1151 = vsyncadd (%p1487_p11), [#allocation6], 4294966016 }
  0x65   : > { %1153 = dma.done.wait (%p1488_p13), [#allocation9], 1024   ;;  %p1489_p2 = pmov %p1486_p10 }
  0x66   : > { %v1184_v0 = vmov 0.0   ;;  %vm1185_vm0 = vmmov 0   ;;  %v978_v1 = vld [vmem:[#allocation5 + $0x8] sm:$0xff]   ;;  %v979_v2 = vld [vmem:[#allocation5] sm:$0xff]   ;;  %vm370_vm1 = vcmask 261120   ;;  %v982_v8 = vld [vmem:[#allocation7 + $0x28] sm:$0xff]  }
  0x67   : > { %1155 = vsyncadd (%p1489_p2), [#allocation9], 4294966272  ;;  %845 = vmatprep.subr.bf16.mxu0 %v1184_v0  ;;  %849 = vmatprep.mubr.msk.bf16.mxu0 %vm1185_vm0, %v1184_v0  ;;  %v344_v3 = vld [vmem:[%s298_s19] sm:$0xff]  ;;  %v345_v4 = vld [vmem:[%s298_s19 + $0x8] sm:$0xff]  ;;  %s785_s11 = sshll.u32 %s1364_s16, 3  ;;  %s818_s15 = sshll.u32 %s1250_s28, 7 }
  0x68   : > { %853 = vmatprep.subr.bf16.mxu1 %v1184_v0  ;;  %869 = vmatprep.mubr.msk.bf16.mxu1 %vm1185_vm0, %v1184_v0  ;;  %v980_v5 = vld [vmem:[#allocation7 + $0x38] sm:$0xff]   ;;  %v346_v6 = vpack.c.bf16 %v345_v4, %v344_v3  ;;  %v981_v7 = vld [vmem:[#allocation7 + $0x30] sm:$0xff]   ;;  %v983_v9 = vld [vmem:[#allocation7 + $0x20] sm:$0xff]   ;;  %s340_s29 = scalar_lea.vmem [#allocation10], %s785_s11  ;;  %s1420_s18 = scalar_lea.hbm %s1470_s7, %s818_s15 }
  0x69   : > { %846 = vmatpush3.bf16.msra.mxu0 %v978_v1  ;;  %854 = vmatpush3.bf16.msra.mxu1 %v980_v5  ;;  %v984_v10 = vld [vmem:[#allocation7 + $0x18] sm:$0xff]   ;;  %v985_v11 = vld [vmem:[#allocation7 + $0x10] sm:$0xff]   ;;  %v986_v12 = vld [vmem:[#allocation7 + $0x8] sm:$0xff]   ;;  %s669_s12 = sshll.u32 %s340_s29, 4  ;;  %s656_s19 = scalar_lea.sflag [#allocation4], %s1364_s16  ;;  %s1415_s12 = int_to_ptr.vmem [resolvable:$true] %s669_s12 }
  0x6a   : > { %847 = vmatprep.subr.bf16.mxu0 %v1184_v0  ;;  %855 = vmatprep.subr.bf16.mxu1 %v1184_v0  ;;  %v987_v13 = vld [vmem:[#allocation7] sm:$0xff]   ;;  %v988_v14 = vld [vmem:[#allocation8 + $0x38] sm:$0xff]   ;;  %v989_v15 = vld [vmem:[#allocation8 + $0x30] sm:$0xff]   ;;  %s1102_s30 = scalar_lea.vmem %s1415_s12, 128  ;;  %p1490_p6 = scmp.ne.s32.totalorder %s1482_s20, 0 }
  0x6b   : > { %v990_v16 = vld [vmem:[#allocation8 + $0x28] sm:$0xff]   ;;  %v991_v17 = vld [vmem:[#allocation8 + $0x20] sm:$0xff]   ;;  %v992_v18 = vld [vmem:[#allocation8 + $0x18] sm:$0xff]   ;;  %p1103_p4 = scmp.ne.s32.totalorder %s1415_s12, %s1102_s30  ;;  %s1186_s28 = smov [#allocation10]  }
  0x6c   : > { %v786_v19 = vld [vmem:[%s1465_s2] ss:$0 sm:$0xff]  ;;  %v994_v30 = vld [vmem:[#allocation8 + $0x8] sm:$0xff]   ;;  %v995_v31 = vld [vmem:[#allocation8] sm:$0xff]   ;;  %s1106_s9 = sshll.u32 %s1186_s28, 4  ;;  %s1107_s9 = int_to_ptr.vmem [resolvable:$false] %s1106_s9 }
  0x6d   : > { %848 = vmatpush3.bf16.msra.mxu0 %v979_v2  ;;  %856 = vmatpush3.bf16.msra.mxu1 %v981_v7  ;;  %v993_v29 = vld [vmem:[#allocation8 + $0x10] sm:$0xff]   ;;  %p1104_p12 = pnand %p1103_p4, %p1490_p6  ;;  %s1108_s23 = scalar_lea.vmem %s1107_s9, 256 }
  0x6e   : > { %873 = vmatprep.subr.bf16.mxu0 %v1184_v0  ;;  %857 = vmatprep.subr.bf16.mxu1 %v1184_v0  ;;  %v790_v32 = vld [vmem:[%s1467_s4] ss:$0 sm:$0xff]  ;;  %p1109_p5 = scmp.lt.s32.totalorder %s1415_s12, %s1107_s9  ;;  %p1110_p3 = scmp.lt.s32.totalorder %s1108_s23, %s1102_s30 }
  0x6f   : > { %v799_v43 = vld [vmem:[%s1469_s6] ss:$0 sm:$0xff]  ;;  %p1105_p0 = pneg %p1104_p12 }
  0x70   : > { %850 = vmatmul.mubr.msk.bf16.vlgmr.msra.gmra.mxu0 %vm370_vm1, %v346_v6  ;;  %p1111_p7 = por %p1110_p3, %p1109_p5 }
  0x71   : > { %889 = vmatprep.mubr.msk.bf16.mxu0 %vm1185_vm0, %v1184_v0  ;;  %858 = vmatpush3.bf16.msra.mxu1 %v982_v8 }
  0x72   : > { %859 = vmatprep.subr.bf16.mxu1 %v1184_v0  ;;  %874 = vmatpush3.bf16.msra.mxu0 %v988_v14  ;;  %p1112_p9 = pnand %p1111_p7, %p1105_p0 }
  0x73   : > { %875 = vmatprep.subr.bf16.mxu0 %v1184_v0 }
  0x75   : > { %860 = vmatpush3.bf16.msra.mxu1 %v983_v9 }
  0x76   : > { %861 = vmatprep.subr.bf16.mxu1 %v1184_v0  ;;  %876 = vmatpush3.bf16.msra.mxu0 %v989_v15 }
  0x77   : > { %877 = vmatprep.subr.bf16.mxu0 %v1184_v0 }
  0x79   : > { %862 = vmatpush3.bf16.msra.mxu1 %v984_v10 }
  0x7a   : > { %863 = vmatprep.subr.bf16.mxu1 %v1184_v0  ;;  %878 = vmatpush3.bf16.msra.mxu0 %v990_v16 }
  0x7b   : > { %879 = vmatprep.subr.bf16.mxu0 %v1184_v0 }
  0x7d   : > { %864 = vmatpush3.bf16.msra.mxu1 %v985_v11 }
  0x7e   : > { %865 = vmatprep.subr.bf16.mxu1 %v1184_v0  ;;  %880 = vmatpush3.bf16.msra.mxu0 %v991_v17 }
  0x7f   : > { %881 = vmatprep.subr.bf16.mxu0 %v1184_v0 }
  0x81   : > { %866 = vmatpush3.bf16.msra.mxu1 %v986_v12 }
  0x82   : > { %867 = vmatprep.subr.bf16.mxu1 %v1184_v0  ;;  %882 = vmatpush3.bf16.msra.mxu0 %v992_v18 }
  0x83   : > { %883 = vmatprep.subr.bf16.mxu0 %v1184_v0 }
  0x85   : > { %868 = vmatpush3.bf16.msra.mxu1 %v987_v13 }
  0x86   : > { %884 = vmatpush3.bf16.msra.mxu0 %v993_v29 }
  0x87   : > { %885 = vmatprep.subr.bf16.mxu0 %v1184_v0 }
  0x8a   : > { %886 = vmatpush3.bf16.msra.mxu0 %v994_v30 }
  0x8b   : > { %887 = vmatprep.subr.bf16.mxu0 %v1184_v0 }
  0x8e   : > { %888 = vmatpush3.bf16.msra.mxu0 %v995_v31 }
 0x130   : > { %v408_v20 = vpop.f32.mrf.mxu0 }
 0x131   : > { %v409_v22 = vadd.f32 %v786_v19, %v408_v20 }
 0x132   : > { %v851_v21 = vpop.f32.mrf.mxu0 }
 0x133   : > { %v415_v26 = vmax.f32 %v409_v22, 0.0 }
 0x134   : > { %v411_v23 = vpop.f32.mrf.mxu0 }
 0x135   : > { %v412_v24 = vadd.f32 %v786_v19, %v411_v23 }
 0x136   : > { %v852_v25 = vpop.f32.mrf.mxu0 }
 0x137   : > { %v416_v27 = vmax.f32 %v412_v24, 0.0 }
 0x139   : > { %v417_v28 = vpack.c.bf16 %v416_v27, %v415_v26 }
 0x13b   : > { %870 = vmatmul.mubr.bf16.vlgmr.msra.gmra.mxu1 %v417_v28 }
 0x1fb   : > { %v523_v33 = vpop.f32.mrf.mxu1 }
 0x1fc   : > { %v524_v35 = vadd.f32 %v790_v32, %v523_v33 }
 0x1fd   : > { %v871_v34 = vpop.f32.mrf.mxu1 }
 0x1fe   : > { %v530_v39 = vmax.f32 %v524_v35, 0.0 }
 0x1ff   : > { %v526_v36 = vpop.f32.mrf.mxu1 }
 0x200   : > { %v527_v37 = vadd.f32 %v790_v32, %v526_v36 }
 0x201   : > { %v872_v38 = vpop.f32.mrf.mxu1 }
 0x202   : > { %v531_v40 = vmax.f32 %v527_v37, 0.0 }
 0x204   : > { %v532_v41 = vpack.c.bf16 %v531_v40, %v530_v39 }
 0x206   : > { %890 = vmatmul.mubr.bf16.vlgmr.msra.gmra.mxu0 %v532_v41 }
 0x2c6   : > { %v638_v42 = vpop.f32.mrf.mxu0 }
 0x2c7   : > { %v639_v46 = vadd.f32 %v799_v43, %v638_v42 }
 0x2c8   : > { %v891_v44 = vpop.f32.mrf.mxu0 }
 0x2ca   : > { %v641_v45 = vpop.f32.mrf.mxu0 }
 0x2cb   : > { %v642_v47 = vadd.f32 %v799_v43, %v641_v45 }
 0x2cc   : > { %v892_v48 = vpop.f32.mrf.mxu0 }
 0x2cd   : > { %v822_v49 = vpack.c.bf16 %v642_v47, %v639_v46 }
 0x2cf   : > { %823 = vst [vmem:[%s340_s29] sm:$0xff] %v822_v49  }
 0x2d0   : > { %1115 = shalt.err (!%p1112_p9)
}
 0x2d1   : > { %s1116_s10 = scalar_lea.hbm %s1420_s18, 128  ;;  %s1120_s21 = scalar_lea.hbm %s1470_s7, 256 }
 0x2d2   : > { %p1117_p1 = scmp.ne.s32.totalorder %s1420_s18, %s1116_s10  ;;  %p1121_p11 = scmp.lt.s32.totalorder %s1420_s18, %s1470_s7 }
 0x2d3   : > { %p1122_p13 = scmp.lt.s32.totalorder %s1120_s21, %s1116_s10 }
 0x2d4   : > { %p1118_p8 = pnand %p1117_p1, %p1490_p6 }
 0x2d5   : > { %p1123_p2 = por %p1122_p13, %p1121_p11 }
 0x2d6   : > { %p1119_p10 = pneg %p1118_p8 }
 0x2d8   : > { %p1124_p4 = pnand %p1123_p2, %p1119_p10 }
 0x2da   : > { %1127 = shalt.err (!%p1124_p4)
}
 0x2db   : > { %s1187_s22 = smov 64   ;;  %s1188_s1 = smov 4  }
 0x2dc   : > { %907 = dma.vmem_to_hbm [thread:$0]  (%p1490_p6), %s1415_s12, 128, %s1420_s18, %s656_s19, %s1187_s22, %s1187_s22, %s1188_s1  }
 0x2dd PF: > { %s684_s30 = sand.u32 1, %s1162_s24   ;;  %p1491_p12 = scmp.ne.s32.totalorder %s1477_s8, 0 }
 0x2de   : > { %p1492_p0 = scmp.ge.s32.totalorder %s1174_s27, 2  ;;  %s685_s28 = scalar_lea.sflag [#allocation4], %s684_s30 }
 0x2e0   : > { %p924_p5 = pnand %p1492_p0, %p1491_p12 }
 0x2e2   : > { %p925_p3 = pneg %p924_p5 }
 0x2e4   : > { %1157 = dma.done.wait (%p925_p3), %s685_s28, 128  }
 0x2e5   : > { %1159 = vsyncadd (%p925_p3), %s685_s28, 4294967168  ;;  %p22_p7 = scmp.ge.s32.totalorder %s1309_s14, 4   ;;  %s1493_s24 = smov %s1166_s25 }
 0x2e6   : > { %s1494_s25 = smov %s1170_s26  ;;  %s1495_s26 = smov %s1319_s17 }
 0x2e7   : > { %s1496_s27 = smov %s1309_s14  ;;  %24 = sbr.rel (!%p22_p7) target bundleno = 9 (0x9), region = 105 }
 0x2ec   :  { %690 = vsyncpa [#allocation3], 1 }
 0x2ed   :  { %692 = vsyncpa [#allocation3 + $0x1], 1 }
 0x2ee   :  { %693 = vsyncpa [#allocation6], 1 }
 0x2ef   :  { %694 = vsyncpa [#allocation9], 1 }
 0x2f0   :  { %695 = vsyncpa [#allocation4], 1 }
 0x2f1   :  { %697 = vsyncpa [#allocation4 + $0x1], 1 }

</bundles_post_ra>
